<compile_context>
chip_gen: v6e
topology: v6e:2x2x1
jax: 0.10.0
libtpu: 0.0.40
codegen_flags: <defaults>
</compile_context>

<pallas_src>
import functools

import jax
import jax.numpy as jnp
from jax.experimental import pallas as pl
from jax.experimental.pallas import tpu as pltpu


def _round_up(x, m):
    return (x + m - 1) // m * m


def _pad2d(x, rows, cols):
    pr, pc = rows - x.shape[0], cols - x.shape[1]
    if pr or pc:
        x = jnp.pad(x, ((0, pr), (0, pc)))
    return x


def _sage_gcn_kernel(a_ref, h_ref, hdst_ref, w_ref, b_ref, *refs, fuse_relu):
    """Grid = (n_dst_tiles, n_src_tiles); src axis is the reduction axis."""
    if fuse_relu:
        o_pre_ref, o_act_ref, acc_ref, deg_ref = refs
    else:
        o_pre_ref, acc_ref, deg_ref = refs
        o_act_ref = None

    k = pl.program_id(1)

    @pl.when(k == 0)
    def _init():
        acc_ref[...] = jnp.zeros_like(acc_ref)
        deg_ref[...] = jnp.zeros_like(deg_ref)

    a = a_ref[...]                                   # (TM, TK) bf16, entries 0/1
    # MXU: accumulate A @ h_src in fp32.
    acc_ref[...] += jnp.dot(a, h_ref[...], preferred_element_type=jnp.float32)
    # Degree as a running row-sum of the A tile already in VMEM (VPU/XLU slot,
    # effectively free while the MXU is busy).
    deg_ref[...] += jnp.sum(a.astype(jnp.float32), axis=1, keepdims=True)

    @pl.when(k == pl.num_programs(1) - 1)
    def _epilogue():
        inv = pl.reciprocal(deg_ref[...] + 1.0, approx=True)      # EUP slot
        agg = (acc_ref[...] + hdst_ref[...].astype(jnp.float32)) * inv
        out = jnp.dot(agg.astype(w_ref.dtype), w_ref[...],
                      preferred_element_type=jnp.float32)
        out = out + b_ref[...].astype(jnp.float32)
        o_pre_ref[...] = out.astype(o_pre_ref.dtype)
        if fuse_relu:
            o_act_ref[...] = jnp.maximum(out, 0.0).astype(o_act_ref.dtype)


def sage_conv_gcn(A, h_src, h_dst, W, b, *, fuse_relu, tm=256, tk=1024):
    """One SAGEConv('gcn') layer as a tiled, pipelined Pallas call.

    A: (n_dst, n_src) dense adjacency (0/1). h_src: (n_src, d_in).
    h_dst: (n_dst, d_in).  W: (d_in, d_out).  b: (1, d_out).
    Returns fp32 pre-activation (n_dst, d_out); if fuse_relu also returns the
    bf16 ReLU'd activation to feed the next layer.
    """
    n_dst, n_src = A.shape
    d_in = h_src.shape[1]
    d_out = W.shape[1]

    # Tile sizes: sublane-aligned row tile, lane-aligned reduction tile.
    TM = min(tm, _round_up(n_dst, 8))
    TK = min(tk, _round_up(n_src, 128))
    DIN = _round_up(d_in, 128)
    DOUT = _round_up(d_out, 128)
    NDST = _round_up(n_dst, TM)
    NSRC = _round_up(n_src, TK)

    # bf16 inputs for the MXU (A is 0/1 so this cast is exact); zero padding is
    # neutral: padded src columns contribute 0 to both A@h and the degree.
    A_p = _pad2d(A.astype(jnp.bfloat16), NDST, NSRC)
    h_p = _pad2d(h_src.astype(jnp.bfloat16), NSRC, DIN)
    hd_p = _pad2d(h_dst.astype(jnp.bfloat16), NDST, DIN)
    W_p = _pad2d(W.astype(jnp.bfloat16), DIN, DOUT)
    b_p = _pad2d(b.astype(jnp.float32), 1, DOUT)

    grid = (NDST // TM, NSRC // TK)

    out_shapes = [jax.ShapeDtypeStruct((NDST, DOUT), jnp.float32)]
    out_specs = [pl.BlockSpec((TM, DOUT), lambda i, k: (i, 0))]
    if fuse_relu:
        out_shapes.append(jax.ShapeDtypeStruct((NDST, DOUT), jnp.bfloat16))
        out_specs.append(pl.BlockSpec((TM, DOUT), lambda i, k: (i, 0)))

    flops = 2 * NDST * NSRC * DIN + 2 * NDST * DIN * DOUT
    bytes_accessed = (
        NDST * NSRC * 2            # A (bf16)
        + NSRC * DIN * 2           # h_src
        + NDST * DIN * 2           # h_dst
        + DIN * DOUT * 2           # W
        + DOUT * 4                 # b
        + NDST * DOUT * (4 + (2 if fuse_relu else 0))  # outputs
    )

    kernel = functools.partial(_sage_gcn_kernel, fuse_relu=fuse_relu)

    results = pl.pallas_call(
        kernel,
        out_shape=tuple(out_shapes) if fuse_relu else out_shapes[0],
        grid_spec=pltpu.PrefetchScalarGridSpec(
            num_scalar_prefetch=0,
            grid=grid,
            in_specs=[
                pl.BlockSpec((TM, TK), lambda i, k: (i, k)),    # A tile
                pl.BlockSpec((TK, DIN), lambda i, k: (k, 0)),   # h_src tile
                pl.BlockSpec((TM, DIN), lambda i, k: (i, 0)),   # h_dst (resident over k)
                pl.BlockSpec((DIN, DOUT), lambda i, k: (0, 0)),  # W (resident)
                pl.BlockSpec((1, DOUT), lambda i, k: (0, 0)),    # b (resident)
            ],
            out_specs=out_specs if fuse_relu else out_specs[0],
            scratch_shapes=[
                pltpu.VMEM((TM, DIN), jnp.float32),  # A@h accumulator
                pltpu.VMEM((TM, 1), jnp.float32),    # degree accumulator
            ],
        ),
        compiler_params=pltpu.CompilerParams(
            dimension_semantics=("parallel", "arbitrary"),
            vmem_limit_bytes=32 * 1024 * 1024,
        ),
        cost_estimate=pl.CostEstimate(
            flops=flops, transcendentals=NDST, bytes_accessed=bytes_accessed),
    )(A_p, h_p, hd_p, W_p, b_p)

    if fuse_relu:
        out_pre, out_act = results
        return out_pre[:n_dst, :d_out], out_act[:n_dst, :d_out]
    return results[:n_dst, :d_out]


def init_sage_params(key, num_layers, input_dim, hidden_dim, output_dim):
    """Deterministic parameter init (xavier-ish scale for W, zeros for bias)."""
    dims = []
    if num_layers == 1:
        dims.append((input_dim, output_dim))
    else:
        dims.append((input_dim, hidden_dim))
        for _ in range(num_layers - 2):
            dims.append((hidden_dim, hidden_dim))
        dims.append((hidden_dim, output_dim))
    params = []
    for (din, dout) in dims:
        key, wk = jax.random.split(key)
        scale = (6.0 / (din + dout)) ** 0.5
        W = jax.random.uniform(wk, (din, dout), jnp.float32, -scale, scale)
        b = jnp.zeros((1, dout), jnp.float32)
        params.append((W, b))
    return params


def sage_forward(params, blocks, feats):
    """Mirrors SAGE.forward: returns (h_list, h).

    blocks: list of (A, num_dst_nodes), one per layer (in-degree is computed
    inside the kernel from A). norm_type='none'.
    NOTE: h_dst = h[:n_dst] relies on the DGL block convention that dst nodes
    are the first n_dst rows of the src ordering.
    """
    # TODO(synk): dropout implemented as identity (eval-mode semantics only).
    num_layers = len(params)
    h = feats
    h_list = []
    for l, ((A, n_dst), (W, b)) in enumerate(zip(blocks, params)):
        h_dst = h[:n_dst]
        if l != num_layers - 1:
            h_pre, h = sage_conv_gcn(A, h, h_dst, W, b, fuse_relu=True)
            h_list.append(h_pre)       # pre-activation, matching the torch code
            # ReLU already fused into the kernel epilogue; dropout: identity.
        else:
            h = sage_conv_gcn(A, h, h_dst, W, b, fuse_relu=False)
    return h_list, h


def sage_forward_ref(params, blocks, feats):
    """Pure-JAX fp32 reference for correctness checking."""
    num_layers = len(params)
    h = feats
    h_list = []
    for l, ((A, n_dst), (W, b)) in enumerate(zip(blocks, params)):
        h_dst = h[:n_dst]
        deg = jnp.sum(A, axis=1, keepdims=True)
        agg = (A @ h + h_dst) / (deg + 1.0)
        h = agg @ W + b
        if l != num_layers - 1:
            h_list.append(h)
            h = jax.nn.relu(h)
    return h_list, h


if __name__ == "__main__":
    key = jax.random.PRNGKey(0)

    # Model config: 2-layer SAGE, relu activation, norm_type='none'
    num_layers = 2
    input_dim, hidden_dim, output_dim = 16, 32, 8

    # Graph blocks: layer 0 has 16 src nodes -> 8 dst nodes,
    #               layer 1 has 8 src nodes  -> 4 dst nodes.
    n_src0, n_dst0, n_dst1 = 16, 8, 4

    key, kf, ka0, ka1 = jax.random.split(key, 4)
    feats = jax.random.normal(kf, (n_src0, input_dim), jnp.float32)

    A0 = (jax.random.uniform(ka0, (n_dst0, n_src0)) < 0.4).astype(jnp.float32)
    A1 = (jax.random.uniform(ka1, (n_dst1, n_dst0)) < 0.4).astype(jnp.float32)

    blocks = [(A0, n_dst0), (A1, n_dst1)]

    params = init_sage_params(key, num_layers, input_dim, hidden_dim, output_dim)

    h_list, h = sage_forward(params, blocks, feats)
    jax.block_until_ready(h)
    for t in h_list:
        jax.block_until_ready(t)

    assert h.shape == (n_dst1, output_dim)
    assert h_list[0].shape == (n_dst0, hidden_dim)

    # Correctness vs. fp32 reference (bf16 inputs + approx reciprocal -> loose tol).
    h_list_ref, h_ref = sage_forward_ref(params, blocks, feats)
    assert float(jnp.max(jnp.abs(h - h_ref))) < 1e-1
    assert float(jnp.max(jnp.abs(h_list[0] - h_list_ref[0]))) < 1e-1

    print("KERNEL_OK")
</pallas_src>

<mosaic_0001>
module attributes {stable_mosaic.version = 11 : i64} {
  func.func @_sage_gcn_kernel(%arg0: i32, %arg1: i32, %arg2: memref<8x128xbf16, #tpu.memory_space<vmem>>, %arg3: memref<128x128xbf16, #tpu.memory_space<vmem>>, %arg4: memref<8x128xbf16, #tpu.memory_space<vmem>>, %arg5: memref<128x128xbf16, #tpu.memory_space<vmem>>, %arg6: memref<1x128xf32, #tpu.memory_space<vmem>>, %arg7: memref<8x128xf32, #tpu.memory_space<vmem>>, %arg8: memref<8x128xbf16, #tpu.memory_space<vmem>>, %arg9: memref<8x128xf32, #tpu.memory_space<vmem>>, %arg10: memref<8x1xf32, #tpu.memory_space<vmem>>) attributes {dimension_semantics = [#tpu.dimension_semantics<parallel>, #tpu.dimension_semantics<arbitrary>], iteration_bounds = array<i64: 1, 1>, scalar_prefetch = 0 : i64, scratch_operands = 2 : i64, tpu.core_type = #tpu.core_type<tc>, window_params = [{transform_indices = @transform_0, window_bounds = array<i64: 8, 128>}, {transform_indices = @transform_1, window_bounds = array<i64: 128, 128>}, {transform_indices = @transform_2, window_bounds = array<i64: 8, 128>}, {pipeline_mode = #tpu.pipeline_mode<synchronous>, transform_indices = @transform_3, window_bounds = array<i64: 128, 128>}, {pipeline_mode = #tpu.pipeline_mode<synchronous>, transform_indices = @transform_4, window_bounds = array<i64: 1, 128>}, {transform_indices = @transform_5, window_bounds = array<i64: 8, 128>}, {transform_indices = @transform_6, window_bounds = array<i64: 8, 128>}]} {
    %c0_i32 = arith.constant 0 : i32
    %0 = arith.cmpi eq, %arg1, %c0_i32 : i32
    %1 = arith.extui %0 : i1 to i32
    %c0_i32_0 = arith.constant 0 : i32
    %2 = arith.cmpi ne, %1, %c0_i32_0 : i32
    scf.if %2 {
      %cst_15 = arith.constant 0.000000e+00 : f32
      %18 = vector.broadcast %cst_15 : f32 to vector<8x128xf32>
      %c0_16 = arith.constant 0 : index
      %c0_17 = arith.constant 0 : index
      %19 = vector.load %arg9[%c0_16, %c0_17] : memref<8x128xf32, #tpu.memory_space<vmem>>, vector<8x128xf32>
      tpu.vector_store %arg9[%c0_16, %c0_17], %18 {strides = array<i32>} : memref<8x128xf32, #tpu.memory_space<vmem>>, vector<8x128xf32>,
      %cst_18 = arith.constant 0.000000e+00 : f32
      %20 = vector.broadcast %cst_18 : f32 to vector<8x1xf32>
      %c0_19 = arith.constant 0 : index
      %c0_20 = arith.constant 0 : index
      %21 = vector.load %arg10[%c0_19, %c0_20] : memref<8x1xf32, #tpu.memory_space<vmem>>, vector<8x1xf32>
      tpu.vector_store %arg10[%c0_19, %c0_20], %20 {strides = array<i32>} : memref<8x1xf32, #tpu.memory_space<vmem>>, vector<8x1xf32>,
    } else {
    }
    %c0 = arith.constant 0 : index
    %c0_1 = arith.constant 0 : index
    %3 = vector.load %arg2[%c0, %c0_1] : memref<8x128xbf16, #tpu.memory_space<vmem>>, vector<8x128xbf16>
    %c0_2 = arith.constant 0 : index
    %c0_3 = arith.constant 0 : index
    %4 = vector.load %arg9[%c0_2, %c0_3] : memref<8x128xf32, #tpu.memory_space<vmem>>, vector<8x128xf32>
    %c0_4 = arith.constant 0 : index
    %c0_5 = arith.constant 0 : index
    %5 = vector.load %arg3[%c0_4, %c0_5] : memref<128x128xbf16, #tpu.memory_space<vmem>>, vector<128x128xbf16>
    %cst = arith.constant dense<0.000000e+00> : vector<8x128xf32>
    %6 = tpu.matmul %3, %5, %cst {dimension_numbers = #tpu.dot_dimension_numbers<[1], [0], [0], [1], [0, 0, 1, 1], [], []>} : vector<8x128xbf16>, vector<128x128xbf16>, vector<8x128xf32> -> vector<8x128xf32>
    %7 = arith.addf %4, %6 : vector<8x128xf32>
    %c0_6 = arith.constant 0 : index
    %c0_7 = arith.constant 0 : index
    %8 = vector.load %arg9[%c0_6, %c0_7] : memref<8x128xf32, #tpu.memory_space<vmem>>, vector<8x128xf32>
    tpu.vector_store %arg9[%c0_6, %c0_7], %7 {strides = array<i32>} : memref<8x128xf32, #tpu.memory_space<vmem>>, vector<8x128xf32>,
    %c0_8 = arith.constant 0 : index
    %c0_9 = arith.constant 0 : index
    %9 = vector.load %arg10[%c0_8, %c0_9] : memref<8x1xf32, #tpu.memory_space<vmem>>, vector<8x1xf32>
    %10 = arith.extf %3 : vector<8x128xbf16> to vector<8x128xf32>
    %cst_10 = arith.constant dense<0.000000e+00> : vector<8xf32>
    %11 = vector.multi_reduction <add>, %10, %cst_10 [1] : vector<8x128xf32> to vector<8xf32>
    %12 = vector.shape_cast %11 : vector<8xf32> to vector<8x1xf32>
    %13 = arith.addf %9, %12 : vector<8x1xf32>
    %c0_11 = arith.constant 0 : index
    %c0_12 = arith.constant 0 : index
    %14 = vector.load %arg10[%c0_11, %c0_12] : memref<8x1xf32, #tpu.memory_space<vmem>>, vector<8x1xf32>
    tpu.vector_store %arg10[%c0_11, %c0_12], %13 {strides = array<i32>} : memref<8x1xf32, #tpu.memory_space<vmem>>, vector<8x1xf32>,
    %c0_i32_13 = arith.constant 0 : i32
    %15 = arith.cmpi eq, %arg1, %c0_i32_13 : i32
    %16 = arith.extui %15 : i1 to i32
    %c0_i32_14 = arith.constant 0 : i32
    %17 = arith.cmpi ne, %16, %c0_i32_14 : i32
    scf.if %17 {
      %c0_15 = arith.constant 0 : index
      %c0_16 = arith.constant 0 : index
      %18 = vector.load %arg10[%c0_15, %c0_16] : memref<8x1xf32, #tpu.memory_space<vmem>>, vector<8x1xf32>
      %cst_17 = arith.constant 1.000000e+00 : f32
      %19 = vector.broadcast %cst_17 : f32 to vector<8x1xf32>
      %20 = arith.addf %18, %19 : vector<8x1xf32>
      %21 = tpu.reciprocal %20 {approx = true} : vector<8x1xf32> -> vector<8x1xf32>
      %c0_18 = arith.constant 0 : index
      %c0_19 = arith.constant 0 : index
      %22 = vector.load %arg9[%c0_18, %c0_19] : memref<8x128xf32, #tpu.memory_space<vmem>>, vector<8x128xf32>
      %c0_20 = arith.constant 0 : index
      %c0_21 = arith.constant 0 : index
      %23 = vector.load %arg4[%c0_20, %c0_21] : memref<8x128xbf16, #tpu.memory_space<vmem>>, vector<8x128xbf16>
      %24 = arith.extf %23 : vector<8x128xbf16> to vector<8x128xf32>
      %25 = arith.addf %22, %24 : vector<8x128xf32>
      %26 = vector.broadcast %21 : vector<8x1xf32> to vector<8x128xf32>
      %27 = arith.mulf %25, %26 : vector<8x128xf32>
      %28 = arith.truncf %27 : vector<8x128xf32> to vector<8x128xbf16>
      %c0_22 = arith.constant 0 : index
      %c0_23 = arith.constant 0 : index
      %29 = vector.load %arg5[%c0_22, %c0_23] : memref<128x128xbf16, #tpu.memory_space<vmem>>, vector<128x128xbf16>
      %cst_24 = arith.constant dense<0.000000e+00> : vector<8x128xf32>
      %30 = tpu.matmul %28, %29, %cst_24 {dimension_numbers = #tpu.dot_dimension_numbers<[1], [0], [0], [1], [0, 0, 1, 1], [], []>} : vector<8x128xbf16>, vector<128x128xbf16>, vector<8x128xf32> -> vector<8x128xf32>
      %c0_25 = arith.constant 0 : index
      %c0_26 = arith.constant 0 : index
      %31 = vector.load %arg6[%c0_25, %c0_26] : memref<1x128xf32, #tpu.memory_space<vmem>>, vector<1x128xf32>
      %32 = vector.broadcast %31 : vector<1x128xf32> to vector<8x128xf32>
      %33 = arith.addf %30, %32 : vector<8x128xf32>
      %c0_27 = arith.constant 0 : index
      %c0_28 = arith.constant 0 : index
      %34 = vector.load %arg7[%c0_27, %c0_28] : memref<8x128xf32, #tpu.memory_space<vmem>>, vector<8x128xf32>
      tpu.vector_store %arg7[%c0_27, %c0_28], %33 {strides = array<i32>} : memref<8x128xf32, #tpu.memory_space<vmem>>, vector<8x128xf32>,
      %cst_29 = arith.constant 0.000000e+00 : f32
      %35 = vector.broadcast %cst_29 : f32 to vector<8x128xf32>
      %36 = arith.maximumf %33, %35 : vector<8x128xf32>
      %37 = arith.truncf %36 : vector<8x128xf32> to vector<8x128xbf16>
      %c0_30 = arith.constant 0 : index
      %c0_31 = arith.constant 0 : index
      %38 = vector.load %arg8[%c0_30, %c0_31] : memref<8x128xbf16, #tpu.memory_space<vmem>>, vector<8x128xbf16>
      tpu.vector_store %arg8[%c0_30, %c0_31], %37 {strides = array<i32>} : memref<8x128xbf16, #tpu.memory_space<vmem>>, vector<8x128xbf16>,
    } else {
    }
    return
  }
  func.func @transform_0(%arg0: i32, %arg1: i32) -> (i32, i32) {
    %c0_i32 = arith.constant 0 : i32
    return %arg0, %arg1 : i32, i32
  }
  func.func @transform_1(%arg0: i32, %arg1: i32) -> (i32, i32) {
    %c0_i32 = arith.constant 0 : i32
    %c0_i32_0 = arith.constant 0 : i32
    return %arg1, %c0_i32 : i32, i32
  }
  func.func @transform_2(%arg0: i32, %arg1: i32) -> (i32, i32) {
    %c0_i32 = arith.constant 0 : i32
    %c0_i32_0 = arith.constant 0 : i32
    return %arg0, %c0_i32 : i32, i32
  }
  func.func @transform_3(%arg0: i32, %arg1: i32) -> (i32, i32) {
    %c0_i32 = arith.constant 0 : i32
    %c0_i32_0 = arith.constant 0 : i32
    %c0_i32_1 = arith.constant 0 : i32
    return %c0_i32, %c0_i32_0 : i32, i32
  }
  func.func @transform_4(%arg0: i32, %arg1: i32) -> (i32, i32) {
    %c0_i32 = arith.constant 0 : i32
    %c0_i32_0 = arith.constant 0 : i32
    %c0_i32_1 = arith.constant 0 : i32
    return %c0_i32, %c0_i32_0 : i32, i32
  }
  func.func @transform_5(%arg0: i32, %arg1: i32) -> (i32, i32) {
    %c0_i32 = arith.constant 0 : i32
    %c0_i32_0 = arith.constant 0 : i32
    return %arg0, %c0_i32 : i32, i32
  }
  func.func @transform_6(%arg0: i32, %arg1: i32) -> (i32, i32) {
    %c0_i32 = arith.constant 0 : i32
    %c0_i32_0 = arith.constant 0 : i32
    return %arg0, %c0_i32 : i32, i32
  }
}

</mosaic_0001>

<bundles_post_ra>
// kernel: tpu_custom_call.1
= control target key start
LH: loop header
LB: loop body
LE: loop exit
PB: predicated region body
PF: predicated region fallthrough
CT: control target
= control target key end

     0   :  { %12 = vsyncpa [#allocation5], 0  ;;  %s671_s0 = inlined_call_operand.hbm [shape: bf16[8,128], index: 0, kind: input, shape index: {}]   ;;  %s672_s1 = inlined_call_operand.hbm [shape: bf16[128,128], index: 1, kind: input, shape index: {}]   ;;  %s673_s2 = inlined_call_operand.hbm [shape: bf16[8,128], index: 2, kind: input, shape index: {}]   ;;  %s674_s3 = inlined_call_operand.hbm [shape: bf16[128,128], index: 3, kind: input, shape index: {}]   ;;  %s675_s4 = inlined_call_operand.vmem [shape: f32[1,128], index: 4, kind: input, shape index: {}]   ;;  %s676_s5 = inlined_call_operand.hbm [shape: f32[8,128], index: 5, kind: output, shape index: {0}]   ;;  %s677_s6 = inlined_call_operand.hbm [shape: bf16[8,128], index: 6, kind: output, shape index: {1}]  }
   0x1   :  { %13 = vsyncpa [#allocation8], 0 }
   0x2   :  { %14 = vsyncpa [#allocation11], 0 }
   0x3   :  { %15 = vsyncpa [#allocation6], 0 }
   0x4   :  { %16 = vsyncpa [#allocation14], 0  ;;  %s596_s21 = smov [#allocation7]  }
   0x5   :  { %s32_s22 = sshll.u32 %s596_s21, 4  ;;  %s33_s22 = int_to_ptr.vmem [resolvable:$true] %s32_s22 }
   0x6   :  { %s474_s23 = scalar_lea.vmem %s33_s22, 1024  ;;  %p479_p1 = scmp.lt.s32.totalorder %s33_s22, %s33_s22 }
   0x7   :  { %p475_p0 = scmp.ne.s32.totalorder %s33_s22, %s474_s23  ;;  %p480_p2 = scmp.lt.s32.totalorder %s474_s23, %s474_s23 }
   0x9   :  { %p481_p3 = por %p480_p2, %p479_p1 }
   0xb   :  { %p482_p4 = pnand %p481_p3, %p475_p0 }
   0xd   :  { %485 = shalt.err (!%p482_p4)
}
   0xe   :  { %s597_s24 = smov 64   ;;  %s598_s25 = smov 4  }
   0xf   :  { %38 = dma.hbm_to_vmem [thread:$0]  %s672_s1, 1024, %s33_s22, [#allocation8], %s597_s24, %s597_s24, %s598_s25  }
  0x10   :  { %s599_s28 = smov [#allocation4]   ;;  %s600_s30 = smov [#allocation9]  }
  0x11   :  { %s23_s29 = sshll.u32 %s599_s28, 4  ;;  %s45_s7 = sshll.u32 %s600_s30, 4  ;;  %s24_s29 = int_to_ptr.vmem [resolvable:$true] %s23_s29  ;;  %s46_s7 = int_to_ptr.vmem [resolvable:$true] %s45_s7 }
  0x12   :  { %s494_s8 = scalar_lea.vmem %s24_s29, 64  ;;  %p499_p6 = scmp.lt.s32.totalorder %s24_s29, %s24_s29 }
  0x13   :  { %p495_p5 = scmp.ne.s32.totalorder %s24_s29, %s494_s8  ;;  %p500_p7 = scmp.lt.s32.totalorder %s494_s8, %s494_s8 }
  0x15   :  { %p501_p8 = por %p500_p7, %p499_p6 }
  0x17   :  { %p502_p9 = pnand %p501_p8, %p495_p5 }
  0x19   :  { %505 = shalt.err (!%p502_p9)
}
  0x1a   :  { %26 = dma.hbm_to_vmem [thread:$0]  %s671_s0, 64, %s24_s29, [#allocation5]  }
  0x1b   :  { %s514_s11 = scalar_lea.vmem %s46_s7, 64  ;;  %p519_p11 = scmp.lt.s32.totalorder %s46_s7, %s46_s7 }
  0x1c   :  { %p515_p10 = scmp.ne.s32.totalorder %s46_s7, %s514_s11  ;;  %p520_p12 = scmp.lt.s32.totalorder %s514_s11, %s514_s11 }
  0x1e   :  { %p521_p13 = por %p520_p12, %p519_p11 }
  0x20   :  { %p522_p0 = pnand %p521_p13, %p515_p10 }
  0x22   :  { %525 = shalt.err (!%p522_p0)
}
  0x23   :  { %48 = dma.hbm_to_vmem [thread:$0]  %s673_s2, 64, %s46_s7, [#allocation8]  }
  0x24   :  { %s601_s13 = smov [#allocation10]  }
  0x25   :  { %s54_s14 = sshll.u32 %s601_s13, 4  ;;  %s55_s14 = int_to_ptr.vmem [resolvable:$true] %s54_s14 }
  0x26   :  { %s534_s15 = scalar_lea.vmem %s55_s14, 1024  ;;  %p539_p2 = scmp.lt.s32.totalorder %s55_s14, %s55_s14 }
  0x27   :  { %p535_p1 = scmp.ne.s32.totalorder %s55_s14, %s534_s15  ;;  %p540_p3 = scmp.lt.s32.totalorder %s534_s15, %s534_s15 }
  0x29   :  { %p541_p4 = por %p540_p3, %p539_p2 }
  0x2b   :  { %p542_p5 = pnand %p541_p4, %p535_p1 }
  0x2d   :  { %545 = shalt.err (!%p542_p5)
}
  0x2e   :  { %60 = dma.hbm_to_vmem [thread:$0]  %s674_s3, 1024, %s55_s14, [#allocation11], %s597_s24, %s597_s24, %s598_s25  }
  0x2f   :  { %586 = dma.done.wait [#allocation5], 64  }
  0x30   :  { %587 = vsyncadd [#allocation5], 4294967232 }
  0x31   :  { %588 = dma.done.wait [#allocation8], 1088  }
  0x32   :  { %589 = vsyncadd [#allocation8], 4294966208 }
  0x33   :  { %590 = dma.done.wait [#allocation11], 1024  }
  0x34   :  { %591 = vsyncadd [#allocation11], 4294966272  ;;  %vm81_vm0 = vcmask 7168   ;;  %v602_v0 = vmov 0.0   ;;  %vm603_vm1 = vmmov 0   ;;  %v448_v3 = vld [vmem:[#allocation7 + $0x38] sm:$0xff]  }
  0x35   :  { %396 = vmatprep.subr.bf16.mxu0 %v602_v0  ;;  %412 = vmatprep.mubr.msk.bf16.mxu0 %vm603_vm1, %v602_v0  ;;  %82 = vst.msk [vmem:[#allocation3] sm:$0xff] %vm81_vm0, %v602_v0  ;;  %v83_v1 = vld [vmem:[#allocation4] sm:$0xf]  ;;  %v449_v4 = vld [vmem:[#allocation7 + $0x30] sm:$0xff]   ;;  %v450_v5 = vld [vmem:[#allocation7 + $0x28] sm:$0xff]   ;;  %v604_v8 = vmov 0  }
  0x36   :  { %416 = vmatprep.subr.bf16.mxu1 %v602_v0  ;;  %432 = vmatprep.mubr.msk.bf16.mxu1 %vm603_vm1, %v602_v0  ;;  %v192_v2 = vunpack.c.l.bf16 %v83_v1  ;;  %v451_v6 = vld [vmem:[#allocation7 + $0x20] sm:$0xff]   ;;  %v452_v7 = vld [vmem:[#allocation7 + $0x18] sm:$0xff]   ;;  %v453_v9 = vld [vmem:[#allocation7 + $0x10] sm:$0xff]   ;;  %s605_s17 = smov [#allocation12]   ;;  %s606_s19 = smov [#allocation13]  }
  0x37   :  { %397 = vmatpush3.bf16.msra.mxu0 %v448_v3  ;;  %447 = vset.pattern.permute.xlu0 %v604_v8  ;;  %v454_v10 = vld [vmem:[#allocation7 + $0x8] sm:$0xff]   ;;  %v455_v11 = vld [vmem:[#allocation7] sm:$0xff]   ;;  %v457_v13 = vld [vmem:[#allocation10 + $0x30] sm:$0xff]   ;;  %s336_s18 = sshll.u32 %s605_s17, 4  ;;  %s346_s20 = sshll.u32 %s606_s19, 4  ;;  %s337_s18 = int_to_ptr.vmem [resolvable:$true] %s336_s18  ;;  %s347_s20 = int_to_ptr.vmem [resolvable:$true] %s346_s20 }
  0x38   :  { %193 = vadd.xlane.f32.xlu0 %v192_v2  ;;  %398 = vmatprep.subr.bf16.mxu0 %v602_v0  ;;  %v456_v12 = vld [vmem:[#allocation10 + $0x38] sm:$0xff]   ;;  %v458_v14 = vld [vmem:[#allocation10 + $0x28] sm:$0xff]   ;;  %v459_v15 = vld [vmem:[#allocation10 + $0x20] sm:$0xff]   ;;  %s546_s21 = scalar_lea.vmem %s337_s18, 128  ;;  %p551_p7 = scmp.lt.s32.totalorder %s337_s18, %s337_s18 }
  0x39   :  { %417 = vmatpush3.bf16.msra.mxu1 %v456_v12  ;;  %v460_v16 = vld [vmem:[#allocation10 + $0x18] sm:$0xff]   ;;  %v461_v17 = vld [vmem:[#allocation10 + $0x10] sm:$0xff]   ;;  %v462_v18 = vld [vmem:[#allocation10 + $0x8] sm:$0xff]   ;;  %p547_p6 = scmp.ne.s32.totalorder %s337_s18, %s546_s21  ;;  %p552_p8 = scmp.lt.s32.totalorder %s546_s21, %s546_s21 }
  0x3a   :  { %418 = vmatprep.subr.bf16.mxu1 %v602_v0  ;;  %v463_v24 = vld [vmem:[#allocation10] sm:$0xff]   ;;  %v205_v30 = vld [vmem:[#allocation9] sm:$0xf]  ;;  %v369_v36 = vld [vmem:[%s675_s4] ss:$0 sm:$0xff] }
  0x3b   :  { %399 = vmatpush3.bf16.msra.mxu0 %v449_v4  ;;  %v206_v31 = vunpack.c.l.bf16 %v205_v30  ;;  %p553_p9 = por %p552_p8, %p551_p7 }
  0x3c   :  { %400 = vmatprep.subr.bf16.mxu0 %v602_v0  ;;  %v191_v19 = vld [vmem:[#allocation3] sm:$0xff] }
  0x3d   :  { %419 = vmatpush3.bf16.msra.mxu1 %v457_v13  ;;  %p554_p10 = pnand %p553_p9, %p547_p6 }
  0x3e   :  { %420 = vmatprep.subr.bf16.mxu1 %v602_v0 }
  0x3f   :  { %401 = vmatpush3.bf16.msra.mxu0 %v450_v5 }
  0x40   :  { %402 = vmatprep.subr.bf16.mxu0 %v602_v0 }
  0x41   :  { %421 = vmatpush3.bf16.msra.mxu1 %v458_v14 }
  0x42   :  { %422 = vmatprep.subr.bf16.mxu1 %v602_v0 }
  0x43   :  { %403 = vmatpush3.bf16.msra.mxu0 %v451_v6 }
  0x44   :  { %404 = vmatprep.subr.bf16.mxu0 %v602_v0 }
  0x45   :  { %423 = vmatpush3.bf16.msra.mxu1 %v459_v15 }
  0x46   :  { %424 = vmatprep.subr.bf16.mxu1 %v602_v0 }
  0x47   :  { %405 = vmatpush3.bf16.msra.mxu0 %v452_v7 }
  0x48   :  { %406 = vmatprep.subr.bf16.mxu0 %v602_v0 }
  0x49   :  { %425 = vmatpush3.bf16.msra.mxu1 %v460_v16 }
  0x4a   :  { %426 = vmatprep.subr.bf16.mxu1 %v602_v0 }
  0x4b   :  { %407 = vmatpush3.bf16.msra.mxu0 %v453_v9 }
  0x4c   :  { %408 = vmatprep.subr.bf16.mxu0 %v602_v0 }
  0x4d   :  { %427 = vmatpush3.bf16.msra.mxu1 %v461_v17 }
  0x4e   :  { %428 = vmatprep.subr.bf16.mxu1 %v602_v0 }
  0x4f   :  { %409 = vmatpush3.bf16.msra.mxu0 %v454_v10 }
  0x50   :  { %410 = vmatprep.subr.bf16.mxu0 %v602_v0 }
  0x51   :  { %429 = vmatpush3.bf16.msra.mxu1 %v462_v18 }
  0x52   :  { %430 = vmatprep.subr.bf16.mxu1 %v602_v0 }
  0x53   :  { %411 = vmatpush3.bf16.msra.mxu0 %v455_v11 }
  0x55   :  { %431 = vmatpush3.bf16.msra.mxu1 %v463_v24 }
  0x56   :  { %413 = vmatmul.mubr.bf16.vlgmr.msra.gmra.mxu0 %v83_v1 }
  0xc1   :  { %v194_v20 = vpop.xlane.xlu0 %193 }
  0xc2   :  { %v195_v21 = vadd.f32 %v194_v20, %v191_v19 }
  0xc4   :  { %197 = vst.msk [vmem:[#allocation3] sm:$0xff] %vm81_vm0, %v195_v21 }
  0xcb   :  { %v201_v22 = vld [vmem:[#allocation3] sm:$0xff] }
  0xcc   :  { %v202_v23 = vadd.f32 1.0, %v201_v22 }
  0xce   :  { %464 = vrcp.f32 %v202_v23 }
  0xdb   :  { %v465_v25 = vpop.eup %464 }
  0xdc   :  { %210 = vperm.xlu0 %447, %v465_v25  }
 0x116   :  { %v183_v26 = vpop.f32.mrf.mxu0 }
 0x117   :  { %v207_v32 = vadd.f32 %v206_v31, %v183_v26 }
 0x118   :  { %v414_v27 = vpop.f32.mrf.mxu0 }
 0x11a   :  { %v186_v28 = vpop.f32.mrf.mxu0 }
 0x11c   :  { %v415_v29 = vpop.f32.mrf.mxu0 }
 0x157   :  { %v211_v33 = vpop.permute.xlu0 %210 }
 0x158   :  { %v213_v34 = vmul.f32 %v211_v33, %v207_v32 }
 0x15a   :  { %v214_v35 = vpack.c.bf16 %v213_v34, %v213_v34 }
 0x15c   :  { %433 = vmatmul.mubr.bf16.vlgmr.msra.gmra.mxu1 %v214_v35 }
 0x21c   :  { %v320_v37 = vpop.f32.mrf.mxu1 }
 0x21d   :  { %v321_v38 = vadd.f32 %v369_v36, %v320_v37 }
 0x21e   :  { %v434_v39 = vpop.f32.mrf.mxu1 }
 0x21f   :  { %v327_v40 = vmax.f32 %v321_v38, 0.0  ;;  %326 = vst [vmem:[#allocation12] sm:$0xff] %v321_v38 }
 0x220   :  { %v323_v41 = vpop.f32.mrf.mxu1 }
 0x221   :  { %557 = shalt.err (!%p554_p10)
}
 0x222   :  { %339 = dma.vmem_to_hbm [thread:$0]  %s337_s18, 128, %s676_s5, [#allocation6]   ;;  %v328_v42 = vpack.c.bf16 %v327_v40, %v327_v40  ;;  %v435_v43 = vpop.f32.mrf.mxu1 }
 0x223   :  { %s566_s23 = scalar_lea.vmem %s347_s20, 64  ;;  %p571_p12 = scmp.lt.s32.totalorder %s347_s20, %s347_s20 }
 0x224   :  { %329 = vst [vmem:[#allocation13] sm:$0xf] %v328_v42  ;;  %p567_p11 = scmp.ne.s32.totalorder %s347_s20, %s566_s23  ;;  %p572_p13 = scmp.lt.s32.totalorder %s566_s23, %s566_s23 }
 0x226   :  { %p573_p0 = por %p572_p13, %p571_p12 }
 0x228   :  { %p574_p1 = pnand %p573_p0, %p567_p11 }
 0x22a   :  { %577 = shalt.err (!%p574_p1)
}
 0x22b   :  { %349 = dma.vmem_to_hbm [thread:$0]  %s347_s20, 64, %s677_s6, [#allocation14]  }
 0x22c   :  { %592 = dma.done.wait [#allocation6], 128  }
 0x22d   :  { %593 = vsyncadd [#allocation6], 4294967168 }
 0x22e   :  { %594 = dma.done.wait [#allocation14], 64  }
 0x22f   :  { %595 = vsyncadd [#allocation14], 4294967232 }
 0x230   :  { %356 = vsyncpa [#allocation5], 1 }
 0x231   :  { %357 = vsyncpa [#allocation8], 1 }
 0x232   :  { %358 = vsyncpa [#allocation11], 1 }
 0x233   :  { %359 = vsyncpa [#allocation6], 1 }
 0x234   :  { %360 = vsyncpa [#allocation14], 1 }

</bundles_post_ra>
